<compile_context>
chip_gen: v7x
topology: tpu7x:2x2x1
jax: 0.10.0
libtpu: 0.0.40
codegen_flags: <defaults>
</compile_context>

<pallas_src>
import functools

import jax
import jax.numpy as jnp
from jax.experimental import pallas as pl
from jax.experimental.pallas import tpu as pltpu


def _dict_conv2d_kernel(tgt_ref, p_ref, w_ref, bias_ref, y_ref, ss_ref,
                        *, B_tile, Cout, OHW, N_real):
    """One grid step = B_tile samples, one MXU matmul.

    tgt_ref  : (N_pad,) int32 in SMEM (scalar prefetch)
    p_ref    : (1, K, B_tile*OHW)  im2col patches for this step (K = Cin*KH*KW)
    w_ref    : (Cout, K)           flattened conv weight
    bias_ref : (Cout, 1)           f32 bias
    y_ref    : (B_tile, Cout, OHW) lane-dense conv output (reshapes to NCHW)
    ss_ref   : (1, 8, 128)         per-step masked sum-of-squares partial
    """
    b0 = pl.program_id(0) * B_tile

    # Single MXU matmul per grid step: (Cout, K) @ (K, B_tile*OHW) -> f32.
    big = jnp.dot(w_ref[...], p_ref[0], preferred_element_type=jnp.float32)
    big = big + bias_ref[...]                       # one lane-broadcast bias add

    ch = jax.lax.broadcasted_iota(jnp.int32, (Cout, 1), 0)
    total = jnp.float32(0.0)
    for bb in range(B_tile):                        # static: only lane-aligned
        acc = big[:, bb * OHW:(bb + 1) * OHW]       # slices, stores, small reduces
        y_ref[bb] = acc.astype(y_ref.dtype)

        # Per-channel sum of squares, target channel of this sample zeroed.
        css = jnp.sum(acc * acc, axis=-1, keepdims=True)      # (Cout, 1)
        css = jnp.where(ch == tgt_ref[b0 + bb], 0.0, css)
        valid = (b0 + bb) < N_real                  # mask batch-padding samples
        total = total + jnp.where(valid, jnp.sum(css), jnp.float32(0.0))

    # Full (1, 8, 128) tile -> unmasked store (no vst.msk per step).
    ss_ref[...] = jnp.full(ss_ref.shape, total, jnp.float32)


def _pick_tiles(N, per_in_bytes, per_out_bytes):
    """Generation-aware batch tiling: ~2 MiB of patches per step, >=4 steps
    when the batch allows, block budget <=48 MiB (safe on v7x's 64 MiB VMEM)."""
    try:
        vmem_cap = int(pltpu.get_tpu_info().vmem_capacity_bytes)
    except Exception:
        vmem_cap = 64 << 20                       # conservative (v7x per-TC)
    budget = min(vmem_cap // 2, 48 << 20)         # headroom for compiler scratch

    per_sample = per_in_bytes + per_out_bytes
    by_bytes = max(1, (2 << 20) // max(per_in_bytes, 1))   # ~2 MiB patches/step
    by_vmem = max(1, budget // max(2 * per_sample, 1))     # 2x = double buffer
    by_steps = max(1, -(-N // 4))                 # keep >=4 grid steps (2 TCs)
    B_tile = max(1, min(by_bytes, by_vmem, by_steps, N))
    NB = -(-N // B_tile)

    needed = 2 * B_tile * per_sample + (8 << 20)
    vmem_limit = int(min(vmem_cap * 3 // 4, max(32 << 20, needed)))
    return B_tile, NB, vmem_limit


def dict_conv2d_forward(x_nchw, targets, weight_oihw, bias, *, nCls,
                        stride=1, padding=0, alpha=0.05,
                        mxu_dtype=jnp.float32):
    """Returns (y in NCHW, dictloss scalar)."""
    assert stride == 1, "kernel implements the module defaults (stride=1)"
    # TODO(synk): general stride / dilation / groups / non-'zeros' padding_mode
    N, Cin, H, W = x_nchw.shape
    Cout, Cin_w, KH, KW = weight_oihw.shape
    assert Cin_w == Cin
    OH = H + 2 * padding - KH + 1
    OW = W + 2 * padding - KW + 1
    OHW = OH * OW
    K = Cin * KH * KW

    # --- wrapper-side glue: zero-pad + im2col (plain XLA slices) -------------
    x_pad = jnp.pad(x_nchw, ((0, 0), (0, 0),
                             (padding, padding), (padding, padding)))
    slabs = [x_pad[:, :, kh:kh + OH, kw:kw + OW]          # (N, Cin, OH, OW)
             for kh in range(KH) for kw in range(KW)]
    # k index = cin*KH*KW + kh*KW + kw  (matches weight.reshape below)
    patches = jnp.stack(slabs, axis=2).reshape(N, K, OHW).astype(mxu_dtype)
    w_flat = weight_oihw.reshape(Cout, K).astype(mxu_dtype)
    bias2d = bias.reshape(Cout, 1).astype(jnp.float32)
    tgt = targets.reshape(-1).astype(jnp.int32)            # targets.view(-1, 1)

    # --- batch tile selection -------------------------------------------------
    per_in = jnp.dtype(mxu_dtype).itemsize * K * OHW
    per_out = jnp.dtype(x_nchw.dtype).itemsize * Cout * OHW
    B_tile, NB, vmem_limit = _pick_tiles(N, per_in, per_out)
    N_pad = NB * B_tile

    if N_pad != N:
        patches = jnp.pad(patches, ((0, N_pad - N), (0, 0), (0, 0)))
        tgt = jnp.pad(tgt, (0, N_pad - N))

    # One (K, B_tile*OHW) slab per grid step: one long MXU dot per step.
    patches_blk = (patches.reshape(NB, B_tile, K, OHW)
                   .transpose(0, 2, 1, 3)
                   .reshape(NB, K, B_tile * OHW))

    kernel = functools.partial(_dict_conv2d_kernel, B_tile=B_tile, Cout=Cout,
                               OHW=OHW, N_real=N)

    grid_spec = pltpu.PrefetchScalarGridSpec(
        num_scalar_prefetch=1,                 # targets live in SMEM
        grid=(NB,),
        in_specs=[
            pl.BlockSpec((1, K, B_tile * OHW), lambda i, tgt: (i, 0, 0)),
            pl.BlockSpec((Cout, K),            lambda i, tgt: (0, 0)),
            pl.BlockSpec((Cout, 1),            lambda i, tgt: (0, 0)),
        ],
        out_specs=[
            pl.BlockSpec((B_tile, Cout, OHW), lambda i, tgt: (i, 0, 0)),
            pl.BlockSpec((1, 8, 128),         lambda i, tgt: (i, 0, 0)),
        ],
    )

    y_flat, ss = pl.pallas_call(
        kernel,
        out_shape=(jax.ShapeDtypeStruct((N_pad, Cout, OHW), x_nchw.dtype),
                   jax.ShapeDtypeStruct((NB, 8, 128), jnp.float32)),
        grid_spec=grid_spec,
        compiler_params=pltpu.CompilerParams(
            dimension_semantics=("parallel",),
            vmem_limit_bytes=vmem_limit),
    )(tgt, patches_blk, w_flat, bias2d)

    y_nchw = y_flat[:N].reshape(N, Cout, OH, OW)   # free: layout is already NCHW
    total_sq = jnp.sum(ss[:, 0, 0])
    dictloss = alpha * jnp.sqrt(total_sq) / N
    return y_nchw, dictloss


def _reference(x, weight, bias, targets, padding, alpha):
    y_ref = jax.lax.conv_general_dilated(
        x, weight, window_strides=(1, 1),
        padding=((padding, padding), (padding, padding)),
        dimension_numbers=("NCHW", "OIHW", "NCHW")) + bias[None, :, None, None]
    h = jnp.ones_like(y_ref)
    h = h.at[jnp.arange(x.shape[0]), targets, :, :].set(0.0)
    loss_ref = alpha * jnp.sqrt(jnp.sum((y_ref * h) ** 2)) / x.shape[0]
    return y_ref, loss_ref


if __name__ == "__main__":
    # Module hyperparameters (small, consistent with DictConv2dLayer defaults).
    Cin, H, W = 4, 16, 16
    Cout, nCls = 8, 4
    KH = KW = 3
    padding = 1
    alpha = 0.05

    key = jax.random.PRNGKey(0)
    kx, kt, kw, kb = jax.random.split(key, 4)

    fan_in = Cin * KH * KW
    bound = 1.0 / (fan_in ** 0.5)
    weight = jax.random.uniform(kw, (Cout, Cin, KH, KW), jnp.float32,
                                -bound, bound)
    bias = jax.random.uniform(kb, (Cout,), jnp.float32, -bound, bound)

    # --- test 1: spec batch (N=2), f32 MXU operands, tight tolerance ---------
    N = 2
    x = jax.random.normal(kx, (N, Cin, H, W), dtype=jnp.float32)
    targets = jax.random.randint(kt, (N,), 0, nCls, dtype=jnp.int32)

    y, dictloss = dict_conv2d_forward(x, targets, weight, bias,
                                      nCls=nCls, stride=1, padding=padding,
                                      alpha=alpha)
    y = jax.block_until_ready(y)
    dictloss = jax.block_until_ready(dictloss)
    y_ref, loss_ref = _reference(x, weight, bias, targets, padding, alpha)
    assert y.shape == (N, Cout, H, W) and y.dtype == jnp.float32
    assert jnp.allclose(y, y_ref, atol=1e-4, rtol=1e-4)
    assert jnp.allclose(dictloss, loss_ref, atol=1e-4, rtol=1e-4)

    # --- test 2: larger batch (N=8) exercises B_tile>1 batched-matmul path ---
    N2 = 8
    kx2, kt2 = jax.random.split(kx)
    x2 = jax.random.normal(kx2, (N2, Cin, H, W), dtype=jnp.float32)
    targets2 = jax.random.randint(kt2, (N2,), 0, nCls, dtype=jnp.int32)

    y2, loss2 = dict_conv2d_forward(x2, targets2, weight, bias,
                                    nCls=nCls, stride=1, padding=padding,
                                    alpha=alpha)
    y2 = jax.block_until_ready(y2)
    y2_ref, loss2_ref = _reference(x2, weight, bias, targets2, padding, alpha)
    assert jnp.allclose(y2, y2_ref, atol=1e-4, rtol=1e-4)
    assert jnp.allclose(loss2, loss2_ref, atol=1e-4, rtol=1e-4)

    # --- test 3: bf16 MXU operand path (halved HBM read stream), loose tol ---
    y3, loss3 = dict_conv2d_forward(x2, targets2, weight, bias,
                                    nCls=nCls, stride=1, padding=padding,
                                    alpha=alpha, mxu_dtype=jnp.bfloat16)
    y3 = jax.block_until_ready(y3)
    assert jnp.allclose(y3, y2_ref, atol=5e-2, rtol=5e-2)
    assert jnp.allclose(loss3, loss2_ref, atol=2e-2, rtol=2e-2)

    print("KERNEL_OK")
</pallas_src>

<mosaic_0001>
module attributes {stable_mosaic.version = 11 : i64} {
  func.func @_dict_conv2d_kernel(%arg0: i32, %arg1: memref<2xi32, #tpu.memory_space<smem>>, %arg2: memref<1x36x256xf32, #tpu.memory_space<vmem>>, %arg3: memref<8x36xf32, #tpu.memory_space<vmem>>, %arg4: memref<8x1xf32, #tpu.memory_space<vmem>>, %arg5: memref<1x8x256xf32, #tpu.memory_space<vmem>>, %arg6: memref<1x8x128xf32, #tpu.memory_space<vmem>>) attributes {dimension_semantics = [#tpu.dimension_semantics<parallel>], iteration_bounds = array<i64: 2>, scalar_prefetch = 1 : i64, scratch_operands = 0 : i64, tpu.core_type = #tpu.core_type<tc>, window_params = [{transform_indices = @transform_0, window_bounds = array<i64: 1, 36, 256>}, {pipeline_mode = #tpu.pipeline_mode<synchronous>, transform_indices = @transform_1, window_bounds = array<i64: 8, 36>}, {pipeline_mode = #tpu.pipeline_mode<synchronous>, transform_indices = @transform_2, window_bounds = array<i64: 8, 1>}, {transform_indices = @transform_3, window_bounds = array<i64: 1, 8, 256>}, {transform_indices = @transform_4, window_bounds = array<i64: 1, 8, 128>}]} {
    %c1_i32 = arith.constant 1 : i32
    %0 = arith.muli %arg0, %c1_i32 : i32
    %c0 = arith.constant 0 : index
    %c0_0 = arith.constant 0 : index
    %1 = vector.load %arg3[%c0, %c0_0] : memref<8x36xf32, #tpu.memory_space<vmem>>, vector<8x36xf32>
    %c0_1 = arith.constant 0 : index
    %c0_2 = arith.constant 0 : index
    %c0_3 = arith.constant 0 : index
    %2 = vector.load %arg2[%c0_1, %c0_2, %c0_3] : memref<1x36x256xf32, #tpu.memory_space<vmem>>, vector<1x36x256xf32>
    %3 = vector.shape_cast %2 : vector<1x36x256xf32> to vector<36x256xf32>
    %cst = arith.constant dense<0.000000e+00> : vector<8x256xf32>
    %4 = tpu.matmul %1, %3, %cst {dimension_numbers = #tpu.dot_dimension_numbers<[1], [0], [0], [1], [0, 0, 1, 1], [], []>} : vector<8x36xf32>, vector<36x256xf32>, vector<8x256xf32> -> vector<8x256xf32>
    %c0_4 = arith.constant 0 : index
    %c0_5 = arith.constant 0 : index
    %5 = vector.load %arg4[%c0_4, %c0_5] : memref<8x1xf32, #tpu.memory_space<vmem>>, vector<8x1xf32>
    %6 = vector.broadcast %5 : vector<8x1xf32> to vector<8x256xf32>
    %7 = arith.addf %4, %6 : vector<8x256xf32>
    %8 = tpu.iota {dimensions = array<i32: 0>} : vector<8x1xi32>
    %c0_6 = arith.constant 0 : index
    %c0_7 = arith.constant 0 : index
    %c0_8 = arith.constant 0 : index
    %9 = vector.load %arg5[%c0_6, %c0_7, %c0_8] : memref<1x8x256xf32, #tpu.memory_space<vmem>>, vector<1x8x256xf32>
    %10 = vector.shape_cast %9 : vector<1x8x256xf32> to vector<8x256xf32>
    %11 = vector.shape_cast %7 : vector<8x256xf32> to vector<1x8x256xf32>
    tpu.vector_store %arg5[%c0_6, %c0_7, %c0_8], %11 {strides = array<i32>} : memref<1x8x256xf32, #tpu.memory_space<vmem>>, vector<1x8x256xf32>,
    %12 = arith.mulf %7, %7 : vector<8x256xf32>
    %cst_9 = arith.constant dense<0.000000e+00> : vector<8xf32>
    %13 = vector.multi_reduction <add>, %12, %cst_9 [1] : vector<8x256xf32> to vector<8xf32>
    %14 = vector.shape_cast %13 : vector<8xf32> to vector<8x1xf32>
    %c0_i32 = arith.constant 0 : i32
    %15 = arith.addi %0, %c0_i32 : i32
    %16 = arith.index_cast %15 : i32 to index
    %17 = memref.load %arg1[%16] : memref<2xi32, #tpu.memory_space<smem>>
    %18 = vector.broadcast %17 : i32 to vector<8x1xi32>
    %19 = arith.cmpi eq, %8, %18 : vector<8x1xi32>
    %cst_10 = arith.constant 0.000000e+00 : f32
    %20 = vector.broadcast %cst_10 : f32 to vector<8x1xf32>
    %21 = arith.select %19, %20, %14 : vector<8x1xi1>, vector<8x1xf32>
    %c0_i32_11 = arith.constant 0 : i32
    %22 = arith.addi %0, %c0_i32_11 : i32
    %c2_i32 = arith.constant 2 : i32
    %23 = arith.cmpi slt, %22, %c2_i32 : i32
    %24 = vector.shape_cast %21 : vector<8x1xf32> to vector<1x8x1xf32>
    %cst_12 = arith.constant dense<0.000000e+00> : vector<1xf32>
    %25 = vector.multi_reduction <add>, %24, %cst_12 [1, 2] : vector<1x8x1xf32> to vector<1xf32>
    %26 = vector.shape_cast %25 : vector<1xf32> to vector<1x1x1xf32>
    %27 = vector.extract %26[0, 0, 0] : f32 from vector<1x1x1xf32>
    %cst_13 = arith.constant 0.000000e+00 : f32
    %28 = arith.select %23, %27, %cst_13 : f32
    %cst_14 = arith.constant 0.000000e+00 : f32
    %29 = arith.addf %cst_14, %28 : f32
    %30 = vector.broadcast %29 : f32 to vector<1x8x128xf32>
    %c0_15 = arith.constant 0 : index
    %c0_16 = arith.constant 0 : index
    %c0_17 = arith.constant 0 : index
    %31 = vector.load %arg6[%c0_15, %c0_16, %c0_17] : memref<1x8x128xf32, #tpu.memory_space<vmem>>, vector<1x8x128xf32>
    tpu.vector_store %arg6[%c0_15, %c0_16, %c0_17], %30 {strides = array<i32>} : memref<1x8x128xf32, #tpu.memory_space<vmem>>, vector<1x8x128xf32>,
    return
  }
  func.func @transform_0(%arg0: i32, %arg1: memref<2xi32, #tpu.memory_space<smem>>) -> (i32, i32, i32) {
    %c0_i32 = arith.constant 0 : i32
    %c0_i32_0 = arith.constant 0 : i32
    %c0_i32_1 = arith.constant 0 : i32
    return %arg0, %c0_i32, %c0_i32_0 : i32, i32, i32
  }
  func.func @transform_1(%arg0: i32, %arg1: memref<2xi32, #tpu.memory_space<smem>>) -> (i32, i32) {
    %c0_i32 = arith.constant 0 : i32
    %c0_i32_0 = arith.constant 0 : i32
    %c0_i32_1 = arith.constant 0 : i32
    return %c0_i32, %c0_i32_0 : i32, i32
  }
  func.func @transform_2(%arg0: i32, %arg1: memref<2xi32, #tpu.memory_space<smem>>) -> (i32, i32) {
    %c0_i32 = arith.constant 0 : i32
    %c0_i32_0 = arith.constant 0 : i32
    %c0_i32_1 = arith.constant 0 : i32
    return %c0_i32, %c0_i32_0 : i32, i32
  }
  func.func @transform_3(%arg0: i32, %arg1: memref<2xi32, #tpu.memory_space<smem>>) -> (i32, i32, i32) {
    %c0_i32 = arith.constant 0 : i32
    %c0_i32_0 = arith.constant 0 : i32
    %c0_i32_1 = arith.constant 0 : i32
    return %arg0, %c0_i32, %c0_i32_0 : i32, i32, i32
  }
  func.func @transform_4(%arg0: i32, %arg1: memref<2xi32, #tpu.memory_space<smem>>) -> (i32, i32, i32) {
    %c0_i32 = arith.constant 0 : i32
    %c0_i32_0 = arith.constant 0 : i32
    %c0_i32_1 = arith.constant 0 : i32
    return %arg0, %c0_i32, %c0_i32_0 : i32, i32, i32
  }
}

</mosaic_0001>

<bundles_post_ra>
// kernel: tpu_custom_call.1
= control target key start
LH: loop header
LB: loop body
LE: loop exit
PB: predicated region body
PF: predicated region fallthrough
CT: control target
= control target key end

     0   :  { %s828_s0 = inlined_call_operand.vmem [shape: s32[2], index: 0, kind: input, shape index: {}]   ;;  %s829_s1 = inlined_call_operand.vmem [shape: f32[2,36,256], index: 1, kind: input, shape index: {}]   ;;  %s830_s2 = inlined_call_operand.vmem [shape: f32[8,36], index: 2, kind: input, shape index: {}]   ;;  %s831_s3 = inlined_call_operand.vmem [shape: f32[8,1], index: 3, kind: input, shape index: {}]   ;;  %s832_s4 = inlined_call_operand.hbm [shape: f32[2,8,256], index: 4, kind: output, shape index: {0}]   ;;  %s833_s5 = inlined_call_operand.hbm [shape: f32[2,8,128], index: 5, kind: output, shape index: {1}]  }
   0x1   :  { %s11_s20 = sshll.u32 %s828_s0, 4  ;;  %s12_s20 = int_to_ptr.vmem [resolvable:$true] %s11_s20 }
   0x2   :  { %s543_s21 = scalar_lea.vmem %s12_s20, 16  ;;  %p548_p1 = scmp.lt.s32.totalorder %s12_s20, %s12_s20 }
   0x3   :  { %p544_p0 = scmp.ne.s32.totalorder %s12_s20, %s543_s21  ;;  %p549_p2 = scmp.lt.s32.totalorder %s543_s21, %s543_s21 }
   0x5   :  { %p550_p3 = por %p549_p2, %p548_p1 }
   0x7   :  { %p551_p4 = pnand %p550_p3, %p544_p0 }
   0x9   :  { %554 = shalt.err (!%p551_p4)  }
   0xa   :  { %s653_s22 = smov [#allocation3]  }
   0xb   :  { %14 = dma.vmem_to_smem %s12_s20, 16, %s653_s22, [#allocation2] }
   0xc   :  { %627 = dma.done.wait [#allocation2], 16 }
   0xd   :  { %628 = vsyncadd [#allocation2], 4294967280 }
   0xe   :  { %16 = sfence }
   0xf   :  { %17 = vsyncpa [#allocation5], 0 }
  0x10   :  { %19 = vsyncpa [#allocation5 + $0x1], 0 }
  0x11   :  { %20 = vsyncpa [#allocation7], 0 }
  0x12   :  { %22 = vsyncpa [#allocation7 + $0x1], 0  ;;  %s691_s23 = smov 0   ;;  %s693_s0 = smov 0  }
  0x13   :  { %s695_s24 = smov 0   ;;  %s697_s25 = smov 0  }
  0x14 LB: > { %s712_s26 = sadd.s32 4294967295, %s651_s25   ;;  %s466_s27 = sadd.s32 4294967294, %s651_s25   ;;  %s651_s25 = sphi %s697_s25, %s839_s25   ;;  %s647_s24 = sphi %s695_s24, %s838_s24   ;;  %s643_s0 = sphi %s693_s0, %s837_s0   ;;  %s639_s23 = sphi %s691_s23, %s836_s23  }
  0x15   : > { %s716_s28 = sadd.s32 1, %s651_s25   ;;  %s103_s29 = sadd.s32 1, %s647_s24 }
  0x16   : > { %s100_s30 = ssub.s32 %s651_s25, %s716_s28  ;;  %p113_p5 = scmp.ne.s32.totalorder %s647_s24, %s643_s0 }
  0x17   : > { %p101_p6 = scmp.eq.s32.totalorder %s100_s30, 0  ;;  %p114_p7 = scmp.eq.s32.totalorder %s712_s26, 1 }
  0x18   : > { %p119_p8 = scmp.ne.s32.totalorder %s643_s0, %s639_s23  ;;  %p120_p9 = scmp.eq.s32.totalorder %s466_s27, 1 }
  0x19   : > { %s727_s6 = scalar_select %p101_p6, %s647_s24, %s103_s29  }
  0x1a   : > { %p729_p10 = por %p114_p7, %p113_p5  ;;  %p733_p11 = por %p120_p9, %p119_p8 }
  0x1b   : > { %p469_p12 = scmp.ge.s32.totalorder %s651_s25, 1  ;;  %p178_p13 = scmp.lt.s32.totalorder %s651_s25, 3 }
  0x1d   : > { %p179_p0 = pnand %p469_p12, %p178_p13 }
  0x1e   : > { %p209_p1 = scmp.lt.s32.totalorder (!%p179_p0), %s712_s26, 1  ;;  %v654_v0 = vmov (!%p179_p0), 0.0   ;;  %v655_v1 = vmov (!%p179_p0), 0   ;;  %v225_v2 = vld [vmem:[%s831_s3] sm:$0xff] (!%p179_p0)  ;;  %vm235_vm0 = vcmask (!%p179_p0), 1043456   ;;  %vm231_vm1 = vcmask (!%p179_p0), 293888  }
  0x1f   : > { %182 = sbr.rel (%p179_p0) target bundleno = 639 (0x27f), region = 32  ;;  %306 = vmatprep.mubr.f32.mxu0 (!%p179_p0), %v654_v0  ;;  %542 = vset.pattern.permute.xlu0 (!%p179_p0), %v655_v1  ;;  %v214_v17 = vld [vmem:[%s830_s2] sm:$0xff] (!%p179_p0)  ;;  %s751_s18 = sand.u32 (!%p179_p0), 1, %s643_s0   ;;  %v313_v26 = vlaneseq (!%p179_p0)  ;;  %vm327_vm3 = vcmask (!%p179_p0), 7168  }
  0x20   : > { %228 = vperm.xlu0 (!%p179_p0), %542, %v225_v2   ;;  %s470_s19 = sshll.u32 (!%p179_p0), %s751_s18, 4  ;;  %s322_s21 = sld [smem:[#allocation3 + %s712_s26]] (!%p179_p0) }
  0x21   : > { %s201_s20 = scalar_lea.vmem (!%p179_p0), [#allocation4], %s470_s19  ;;  %v314_v27 = vshrl.u32 (!%p179_p0), %v313_v26, 7  ;;  %s483_s22 = sshll.u32 (!%p179_p0), %s712_s26, 8 }
  0x22   : > { %s362_s27 = sshll.u32 (!%p179_p0), %s201_s20, 4  ;;  %s759_s9 = scalar_lea.hbm (!%p179_p0), %s832_s4, %s483_s22  ;;  %s363_s27 = int_to_ptr.vmem [resolvable:$true] %s362_s27 }
  0x23   : > { %s343_s10 = scalar_lea.sflag (!%p179_p0), [#allocation5], %s751_s18 }
  0x26   : > { %s210_s11 = scalar_select %p209_p1, %s712_s26, 1  ;;  %v323_v28 = vstv %s322_s21 }
  0x27   : > { %vm324_vm2 = vcmp.eq.s32.totalorder %v314_v27, %v323_v28 }
  0x28   : > { %s492_s12 = smul.u32 80, %s210_s11  ;;  %s555_s11 = scalar_lea.vmem %s363_s27, 256 }
  0x29   : > { %p556_p2 = scmp.ne.s32.totalorder %s363_s27, %s555_s11 }
  0x2a   : > { %s213_s15 = scalar_lea.vmem %s829_s1, %s492_s12  ;;  %s656_s12 = smov [#allocation4]  }
  0x2b   : > { %v216_v3 = vld [vmem:[%s213_s15 + $0x8] sm:$0xff]  ;;  %v218_v4 = vld [vmem:[%s213_s15 + $0x18] sm:$0xff]  ;;  %v215_v5 = vld [vmem:[%s213_s15] sm:$0xff]  ;;  %p557_p3 = pnand %p556_p2, %p729_p10  ;;  %s559_s13 = sshll.u32 %s656_s12, 4  ;;  %s560_s13 = int_to_ptr.vmem [resolvable:$false] %s559_s13 }
  0x2c   : > { %v484_v6 = vpack.c.bf16 %v218_v4, %v216_v3  ;;  %v217_v7 = vld [vmem:[%s213_s15 + $0x10] sm:$0xff]  ;;  %v220_v8 = vld [vmem:[%s213_s15 + $0x28] sm:$0xff]  ;;  %v222_v9 = vld [vmem:[%s213_s15 + $0x38] sm:$0xff]  ;;  %s561_s14 = scalar_lea.vmem %s560_s13, 512  ;;  %p562_p5 = scmp.lt.s32.totalorder %s363_s27, %s560_s13 }
  0x2d   : > { %v486_v10 = vpack.c.bf16 %v217_v7, %v215_v5  ;;  %v488_v11 = vpack.c.bf16 %v222_v9, %v220_v8  ;;  %v219_v12 = vld [vmem:[%s213_s15 + $0x20] sm:$0xff]  ;;  %v221_v13 = vld [vmem:[%s213_s15 + $0x30] sm:$0xff]  ;;  %v224_v15 = vld [vmem:[%s213_s15 + $0x48] sm:$0xf]  ;;  %p558_p4 = pneg %p557_p3  ;;  %p563_p6 = scmp.lt.s32.totalorder %s561_s14, %s555_s11 }
  0x2e   : > { %485 = vmatprep.subr.bf16.mxu0 %v484_v6  ;;  %v490_v14 = vpack.c.bf16 %v221_v13, %v219_v12  ;;  %v223_v16 = vld [vmem:[%s213_s15 + $0x40] sm:$0xf] }
  0x2f   : > { %487 = vmatpush1.bf16.msra.mxu0 %v486_v10  ;;  %p564_p7 = por %p563_p6, %p562_p5 }
  0x30   : > { %489 = vmatprep.subr.bf16.mxu0 %v488_v11 }
  0x31   : > { %p565_p8 = pnand %p564_p7, %p558_p4 }
  0x33   : > { %491 = vmatpush1.bf16.msra.mxu0 %v490_v14 }
  0x34   : > { %473 = vmatprep.subr.msk.mxu0 %vm235_vm0, %v224_v15 }
  0x37   : > { %474 = vmatpush1.msk.msra.mxu0 %vm235_vm0, %v223_v16 }
  0x38   : > { %475 = vmatmul.mubr.msk.f32.vlgmr.msra.gmra.mrb[0].mxu0 %vm231_vm1, %v214_v17 }
  0x9f   : > { %v229_v18 = vpop.permute.xlu0 %228 }
 0x10b   : > { %v308_v19 = vpop.f32.mrb[0].mxu0 }
 0x10c   : > { %v309_v20 = vadd.f32 %v308_v19, %v229_v18  ;;  %v310_v21 = vpop.f32.mrb[1].mxu0 }
 0x10d   : > { %v311_v22 = vadd.f32 %v310_v21, %v229_v18 }
 0x10e   : > { %315 = vst [vmem:[%s201_s20] sm:$0xff] %v309_v20  ;;  %v317_v23 = vmul.f32 %v309_v20, %v309_v20 }
 0x10f   : > { %316 = vst [vmem:[%s201_s20 + $0x8] sm:$0xff] %v311_v22  ;;  %v318_v24 = vmul.f32 %v311_v22, %v311_v22 }
 0x111   : > { %v319_v25 = vadd.f32 %v318_v24, %v317_v23 }
 0x113   : > { %320 = vadd.xlane.f32.xlu0 %v319_v25 }
 0x1a0   : > { %v321_v29 = vpop.xlane.xlu0 %320 }
 0x1a1   : > { %v325_v30 = vsel %vm324_vm2, 0.0, %v321_v29 }
 0x1a2   : > { %v328_v31 = vsel %vm327_vm3, %v325_v30, 0.0 }
 0x1a3   : > { %329 = vadd.xlane.f32.xlu1 %v328_v31 }
 0x1a4   : > { %568 = shalt.err (!%p565_p8)
}
 0x1a5   : > { %s569_s15 = scalar_lea.hbm %s759_s9, 256  ;;  %s573_s19 = scalar_lea.hbm %s832_s4, 512 }
 0x1a6   : > { %p570_p9 = scmp.ne.s32.totalorder %s759_s9, %s569_s15  ;;  %p574_p0 = scmp.lt.u32.totalorder %s759_s9, %s832_s4 }
 0x1a7   : > { %p575_p1 = scmp.lt.u32.totalorder %s573_s19, %s569_s15  ;;  %p577_p3 = scmp.lt.u32.totalorder %s569_s15, %s759_s9 }
 0x1a8   : > { %p571_p12 = pnand %p570_p9, %p729_p10 }
 0x1a9   : > { %p576_p2 = por %p575_p1, %p574_p0 }
 0x1aa   : > { %p572_p13 = pneg %p571_p12 }
 0x1ab   : > { %p578_p4 = por %p577_p3, %p576_p2 }
 0x1ad   : > { %p579_p5 = pnand %p578_p4, %p572_p13 }
 0x1af   : > { %582 = shalt.err (!%p579_p5)
}
 0x1b0   : > { %495 = dma.vmem_to_hbm [thread:$0]  (%p729_p10), %s363_s27, 256, %s759_s9, %s343_s10  }
 0x1b1   : > { %s471_s22 = sshll.u32 %s751_s18, 3  ;;  %p326_p6 = scmp.lt.s32.totalorder %s712_s26, 2 }
 0x1b2   : > { %s480_s29 = sshll.u32 %s712_s26, 7  ;;  %s208_s30 = scalar_lea.vmem [#allocation6], %s471_s22 }
 0x1b3   : > { %s375_s11 = sshll.u32 %s208_s30, 4  ;;  %s785_s27 = scalar_lea.hbm %s833_s5, %s480_s29  ;;  %s787_s11 = int_to_ptr.vmem [resolvable:$true] %s375_s11 }
 0x1b4   : > { %s348_s9 = scalar_lea.sflag [#allocation7], %s751_s18  ;;  %s583_s10 = scalar_lea.vmem %s787_s11, 128 }
 0x1b5   : > { %p584_p7 = scmp.ne.s32.totalorder %s787_s11, %s583_s10  ;;  %s657_s26 = smov [#allocation6]  }
 0x1b6   : > { %s587_s15 = sshll.u32 %s657_s26, 4  ;;  %s588_s15 = int_to_ptr.vmem [resolvable:$false] %s587_s15 }
 0x1b7   : > { %p585_p8 = pnand %p584_p7, %p729_p10  ;;  %s589_s16 = scalar_lea.vmem %s588_s15, 256 }
 0x1b8   : > { %p590_p12 = scmp.lt.s32.totalorder %s787_s11, %s588_s15  ;;  %p591_p13 = scmp.lt.s32.totalorder %s589_s16, %s583_s10 }
 0x1b9   : > { %p586_p9 = pneg %p585_p8 }
 0x1ba   : > { %p592_p0 = por %p591_p13, %p590_p12 }
 0x1bc   : > { %p593_p1 = pnand %p592_p0, %p586_p9 }
 0x230   : > { %v330_v32 = vpop.xlane.xlu1 %329 }
 0x231   : > { %v331_v33 = vrot.slane %v330_v32, 4 }
 0x233   : > { %v332_v34 = vadd.f32 %v331_v33, %v330_v32 }
 0x235   : > { %v333_v35 = vrot.slane %v332_v34, 2 }
 0x237   : > { %v334_v36 = vadd.f32 %v333_v35, %v332_v34 }
 0x239   : > { %v335_v37 = vrot.slane %v334_v36, 1 }
 0x23b   : > { %v336_v38 = vadd.f32 %v335_v37, %v334_v36 }
 0x23d   : > { %493 = vpush %v336_v38 }
 0x26e   : > { %s494_s12 = spop %493 }
 0x26f   : > { %s841_s12 = smov (!%p326_p6, %s494_s12), 0.0 }
 0x270   : > { %v340_v39 = vstv %s841_s12 }
 0x271   : > { %341 = vst [vmem:[%s208_s30] sm:$0xff] %v340_v39 }
 0x272   : > { %596 = shalt.err (!%p593_p1)
}
 0x273   : > { %s597_s18 = scalar_lea.hbm %s785_s27, 128  ;;  %s601_s20 = scalar_lea.hbm %s833_s5, 256 }
 0x274   : > { %p598_p2 = scmp.ne.s32.totalorder %s785_s27, %s597_s18  ;;  %p602_p5 = scmp.lt.u32.totalorder %s785_s27, %s833_s5 }
 0x275   : > { %p603_p6 = scmp.lt.u32.totalorder %s601_s20, %s597_s18  ;;  %p605_p8 = scmp.lt.u32.totalorder %s597_s18, %s785_s27 }
 0x276   : > { %p599_p3 = pnand %p598_p2, %p729_p10 }
 0x277   : > { %p604_p7 = por %p603_p6, %p602_p5 }
 0x278   : > { %p600_p4 = pneg %p599_p3 }
 0x279   : > { %p606_p9 = por %p605_p8, %p604_p7 }
 0x27b   : > { %p607_p12 = pnand %p606_p9, %p600_p4 }
 0x27d   : > { %610 = shalt.err (!%p607_p12)
}
 0x27e   : > { %496 = dma.vmem_to_hbm [thread:$0]  (%p729_p10), %s787_s11, 128, %s785_s27, %s348_s9  }
 0x27f PF: > { %p506_p13 = scmp.ge.s32.totalorder %s651_s25, 2  ;;  %s387_s29 = sand.u32 1, %s639_s23  }
 0x280   : > { %s388_s30 = scalar_lea.sflag [#allocation5], %s387_s29 }
 0x281   : > { %p500_p0 = pnand %p506_p13, %p733_p11 }
 0x283   : > { %630 = dma.done.wait (!%p500_p0), %s388_s30, 256  }
 0x284   : > { %632 = vsyncadd (!%p500_p0), %s388_s30, 4294967040  ;;  %s397_s12 = scalar_lea.sflag [#allocation7], %s387_s29 }
 0x285   : > { %634 = dma.done.wait (!%p500_p0), %s397_s12, 128  }
 0x286   : > { %636 = vsyncadd (!%p500_p0), %s397_s12, 4294967168  ;;  %p25_p10 = scmp.ge.s32.totalorder %s716_s28, 4   ;;  %s836_s23 = smov %s643_s0 }
 0x287   : > { %s837_s0 = smov %s647_s24  ;;  %s838_s24 = smov %s727_s6 }
 0x288   : > { %s839_s25 = smov %s716_s28  ;;  %27 = sbr.rel (!%p25_p10) target bundleno = 20 (0x14), region = 84 }
 0x28f   :  { %402 = vsyncpa [#allocation5], 1 }
 0x290   :  { %404 = vsyncpa [#allocation5 + $0x1], 1 }
 0x291   :  { %405 = vsyncpa [#allocation7], 1 }
 0x292   :  { %407 = vsyncpa [#allocation7 + $0x1], 1 }

</bundles_post_ra>
